<compile_context>
chip_gen: v6e
topology: v6e:2x2x1
jax: 0.10.0
libtpu: 0.0.40
codegen_flags: <defaults>
</compile_context>

<pallas_src>
import math
import functools

import jax
import jax.numpy as jnp
from jax.experimental import pallas as pl
from jax.experimental.pallas import tpu as pltpu


def _round_up(v, m):
    return ((v + m - 1) // m) * m


def _tpu_vmem_bytes():
    """Physical per-core VMEM, with a safe fallback if the query fails."""
    try:
        return int(pltpu.get_tpu_info().vmem_capacity_bytes)
    except Exception:
        return 64 * 1024 * 1024


def _default_tiles(vmem_bytes):
    """Generation-aware default tiles (bf16 operands, f32 accumulator)."""
    if vmem_bytes >= 100 * 1024 * 1024:
        # v5e / v6e (128 MiB VMEM): push N to 1024 for higher arithmetic
        # intensity (v6e needs ~680 FLOP/byte to be compute-bound).
        return 512, 1024, 512
    # v7x (64 MiB VMEM): 512^3 tiles (~256 FLOP/byte) reach its roofline
    # and fit comfortably with double buffering.
    return 512, 512, 512


def _linear_bias_kernel(x_ref, w_ref, b_ref, o_ref, acc_ref):
    # x_ref: (tm, tk)  w_ref: (tk, tn)  b_ref: (1, tn) f32
    # o_ref: (tm, tn)  acc_ref: (tm, tn) f32 scratch
    @pl.when(pl.program_id(2) == 0)
    def _init():
        # Fold the bias into the accumulator init (f32): same numerics as
        # adding it at the end, but no extra add/DMA in the finalize step.
        acc_ref[...] = jnp.broadcast_to(b_ref[...], acc_ref.shape)

    acc_ref[...] += jnp.dot(x_ref[...], w_ref[...],
                            preferred_element_type=jnp.float32)

    @pl.when(pl.program_id(2) == pl.num_programs(2) - 1)
    def _finalize():
        o_ref[...] = acc_ref[...].astype(o_ref.dtype)


def _linear_nobias_kernel(x_ref, w_ref, o_ref, acc_ref):
    @pl.when(pl.program_id(2) == 0)
    def _init():
        acc_ref[...] = jnp.zeros_like(acc_ref)

    acc_ref[...] += jnp.dot(x_ref[...], w_ref[...],
                            preferred_element_type=jnp.float32)

    @pl.when(pl.program_id(2) == pl.num_programs(2) - 1)
    def _finalize():
        o_ref[...] = acc_ref[...].astype(o_ref.dtype)


@functools.partial(jax.jit, static_argnames=("tm", "tn", "tk", "compute_dtype"))
def linear_forward(x, w, bias=None, *, tm=None, tn=None, tk=None,
                   compute_dtype=jnp.bfloat16):
    """y = x @ w (+ bias), tiled Pallas TPU kernel with f32 accumulation.

    x:    (B, K)  w: (K, N)  bias: (N,) or None
    compute_dtype: operand dtype fed to the MXU.  Defaults to bfloat16
                   (bf16-native MXU on v5e/v6e/v7x, ~4x throughput and half
                   the operand HBM traffic vs f32); accumulation is always
                   f32.  Pass jnp.float32 for exact-f32 operands.
    """
    B, K = x.shape
    K2, N = w.shape
    assert K == K2, "x / w contraction dims mismatch"

    out_dtype = x.dtype
    if compute_dtype is None:
        compute_dtype = jnp.bfloat16

    vmem_bytes = _tpu_vmem_bytes()
    tm_d, tn_d, tk_d = _default_tiles(vmem_bytes)
    tm = tm_d if tm is None else tm
    tn = tn_d if tn is None else tn
    tk = tk_d if tk is None else tk

    # Adapt tiles to the (possibly tiny) problem, keeping lanes dense and
    # minimising M-padding waste (e.g. B=300, tm=512 -> tm=304, not 512).
    n_blocks_m = max(1, -(-B // tm))
    tm = _round_up(-(-B // n_blocks_m), 8)
    tn = min(tn, _round_up(N, 128))    # lane-dense output columns
    tk = min(tk, _round_up(K, 128))    # lane-dense contraction

    Mp = _round_up(B, tm)
    Kp = _round_up(K, tk)
    Np = _round_up(N, tn)

    # Cast + pad.  allow_input_fusion below lets XLA fuse these producers
    # into the pallas_call operands instead of materialising copies in HBM.
    xp = x.astype(compute_dtype)
    if (Mp, Kp) != (B, K):
        xp = jnp.pad(xp, ((0, Mp - B), (0, Kp - K)))
    wp = w.astype(compute_dtype)
    if (Kp, Np) != (K, N):
        wp = jnp.pad(wp, ((0, Kp - K), (0, Np - N)))

    grid = (Mp // tm, Np // tn, Kp // tk)

    x_spec = pl.BlockSpec((tm, tk), lambda i, j, k: (i, k))
    w_spec = pl.BlockSpec((tk, tn), lambda i, j, k: (k, j))
    o_spec = pl.BlockSpec((tm, tn), lambda i, j, k: (i, j))

    # Explicit VMEM budget: double-buffered inputs + output, f32 acc, bias.
    # Cap at ~85% of physical VMEM so the compiler keeps headroom for its
    # internal scratch (critical on v7x's 64 MiB; generous on 128 MiB chips).
    in_isz = jnp.dtype(compute_dtype).itemsize
    out_isz = jnp.dtype(out_dtype).itemsize
    footprint = (2 * (tm * tk + tk * tn) * in_isz
                 + 2 * tm * tn * out_isz
                 + tm * tn * 4
                 + 2 * tn * 4)
    vmem_cap = int(vmem_bytes * 0.85)
    vmem_limit = int(min(max(2 * footprint, 16 * 1024 * 1024), vmem_cap))

    cost = pl.CostEstimate(
        flops=2 * Mp * Kp * Np,
        transcendentals=0,
        bytes_accessed=(Mp * Kp * in_isz + Kp * Np * in_isz
                        + Mp * Np * out_isz + Np * 4),
    )

    scratch_shapes = [pltpu.VMEM((tm, tn), jnp.float32)]
    out_shape = jax.ShapeDtypeStruct((Mp, Np), out_dtype)

    if bias is None:
        compiler_params = pltpu.CompilerParams(
            dimension_semantics=("parallel", "parallel", "arbitrary"),
            vmem_limit_bytes=vmem_limit,
            allow_input_fusion=[True, True],
        )
        out = pl.pallas_call(
            _linear_nobias_kernel,
            out_shape=out_shape,
            grid=grid,
            in_specs=[x_spec, w_spec],
            out_specs=o_spec,
            scratch_shapes=scratch_shapes,
            compiler_params=compiler_params,
            cost_estimate=cost,
        )(xp, wp)
    else:
        bp = bias.astype(jnp.float32).reshape(1, N)   # bias stays f32
        if Np != N:
            bp = jnp.pad(bp, ((0, 0), (0, Np - N)))
        b_spec = pl.BlockSpec((1, tn), lambda i, j, k: (0, j))
        compiler_params = pltpu.CompilerParams(
            dimension_semantics=("parallel", "parallel", "arbitrary"),
            vmem_limit_bytes=vmem_limit,
            allow_input_fusion=[True, True, True],
        )
        out = pl.pallas_call(
            _linear_bias_kernel,
            out_shape=out_shape,
            grid=grid,
            in_specs=[x_spec, w_spec, b_spec],
            out_specs=o_spec,
            scratch_shapes=scratch_shapes,
            compiler_params=compiler_params,
            cost_estimate=cost,
        )(xp, wp, bp)

    if (Mp, Np) != (B, N):
        out = out[:B, :N]
    return out


def make_params(key, in_features, out_features):
    """Deterministic init mirroring the module's parameter structure:
    a list of `in_features` row-parameters of shape (1, out_features) plus a
    bias of shape (out_features,).  Kaiming-uniform(a=sqrt(5)) on a
    (1, out_features) tensor has fan_in = out_features -> bound = 1/sqrt(out);
    bias bound = 1/sqrt(in_features)."""
    keys = jax.random.split(key, in_features + 1)
    w_bound = 1.0 / math.sqrt(out_features)
    weight_list = [
        jax.random.uniform(keys[i], (1, out_features), jnp.float32,
                           minval=-w_bound, maxval=w_bound)
        for i in range(in_features)
    ]
    b_bound = 1.0 / math.sqrt(in_features)
    bias = jax.random.uniform(keys[-1], (out_features,), jnp.float32,
                              minval=-b_bound, maxval=b_bound)
    return weight_list, bias


if __name__ == "__main__":
    # NOTE: at this demo size the kernel is fixed-overhead dominated; the
    # tiling/budget logic targets large B/K/N where the (M,N,K) pipeline pays.
    in_features = 32
    out_features = 64
    batch = 8

    key = jax.random.PRNGKey(0)
    k_x, k_p = jax.random.split(key)

    weight_list, bias = make_params(k_p, in_features, out_features)
    # Glue: emulate torch.cat(weight_list, 0) -> (in_features, out_features)
    W = jnp.concatenate(weight_list, axis=0)

    x = jax.random.normal(k_x, (batch, in_features), dtype=jnp.float32)
    y_ref = x @ W + bias[None, :]

    # Default (bf16 operands, f32 accumulation) — looser tolerance.
    y = jax.block_until_ready(linear_forward(x, W, bias))
    assert y.shape == (batch, out_features)
    assert jnp.allclose(y, y_ref, atol=2e-2, rtol=2e-2), \
        "mismatch vs reference (bias, bf16 compute)"

    # Exact-f32 operand path — tight tolerance.
    y_f32 = jax.block_until_ready(
        linear_forward(x, W, bias, compute_dtype=jnp.float32))
    assert jnp.allclose(y_f32, y_ref, atol=1e-5, rtol=1e-5), \
        "mismatch vs reference (bias, f32 compute)"

    # bias=False path (module's register_parameter('bias', None)).
    y_nb = jax.block_until_ready(
        linear_forward(x, W, None, compute_dtype=jnp.float32))
    assert jnp.allclose(y_nb, x @ W, atol=1e-5, rtol=1e-5), \
        "mismatch vs reference (no bias)"

    print("KERNEL_OK")
</pallas_src>

<mosaic_0001>
module attributes {stable_mosaic.version = 11 : i64} {
  func.func @_linear_bias_kernel(%arg0: i32, %arg1: i32, %arg2: i32, %arg3: memref<8x128xbf16, #tpu.memory_space<vmem>>, %arg4: memref<128x128xbf16, #tpu.memory_space<vmem>>, %arg5: memref<1x128xf32, #tpu.memory_space<vmem>>, %arg6: memref<8x128xf32, #tpu.memory_space<vmem>>, %arg7: memref<8x128xf32, #tpu.memory_space<vmem>>) attributes {dimension_semantics = [#tpu.dimension_semantics<parallel>, #tpu.dimension_semantics<parallel>, #tpu.dimension_semantics<arbitrary>], iteration_bounds = array<i64: 1, 1, 1>, scalar_prefetch = 0 : i64, scratch_operands = 1 : i64, tpu.core_type = #tpu.core_type<tc>, window_params = [{transform_indices = @transform_0, window_bounds = array<i64: 8, 128>}, {transform_indices = @transform_1, window_bounds = array<i64: 128, 128>}, {transform_indices = @transform_2, window_bounds = array<i64: 1, 128>}, {transform_indices = @transform_3, window_bounds = array<i64: 8, 128>}]} {
    %c0_i32 = arith.constant 0 : i32
    %0 = arith.cmpi eq, %arg2, %c0_i32 : i32
    %1 = arith.extui %0 : i1 to i32
    %c0_i32_0 = arith.constant 0 : i32
    %2 = arith.cmpi ne, %1, %c0_i32_0 : i32
    scf.if %2 {
      %c0_10 = arith.constant 0 : index
      %c0_11 = arith.constant 0 : index
      %12 = vector.load %arg5[%c0_10, %c0_11] : memref<1x128xf32, #tpu.memory_space<vmem>>, vector<1x128xf32>
      %13 = vector.shape_cast %12 : vector<1x128xf32> to vector<1x128xf32>
      %14 = vector.broadcast %13 : vector<1x128xf32> to vector<8x128xf32>
      %c0_12 = arith.constant 0 : index
      %c0_13 = arith.constant 0 : index
      %15 = vector.load %arg7[%c0_12, %c0_13] : memref<8x128xf32, #tpu.memory_space<vmem>>, vector<8x128xf32>
      tpu.vector_store %arg7[%c0_12, %c0_13], %14 {strides = array<i32>} : memref<8x128xf32, #tpu.memory_space<vmem>>, vector<8x128xf32>,
    } else {
    }
    %c0 = arith.constant 0 : index
    %c0_1 = arith.constant 0 : index
    %3 = vector.load %arg7[%c0, %c0_1] : memref<8x128xf32, #tpu.memory_space<vmem>>, vector<8x128xf32>
    %c0_2 = arith.constant 0 : index
    %c0_3 = arith.constant 0 : index
    %4 = vector.load %arg3[%c0_2, %c0_3] : memref<8x128xbf16, #tpu.memory_space<vmem>>, vector<8x128xbf16>
    %c0_4 = arith.constant 0 : index
    %c0_5 = arith.constant 0 : index
    %5 = vector.load %arg4[%c0_4, %c0_5] : memref<128x128xbf16, #tpu.memory_space<vmem>>, vector<128x128xbf16>
    %cst = arith.constant dense<0.000000e+00> : vector<8x128xf32>
    %6 = tpu.matmul %4, %5, %cst {dimension_numbers = #tpu.dot_dimension_numbers<[1], [0], [0], [1], [0, 0, 1, 1], [], []>} : vector<8x128xbf16>, vector<128x128xbf16>, vector<8x128xf32> -> vector<8x128xf32>
    %7 = arith.addf %3, %6 : vector<8x128xf32>
    %c0_6 = arith.constant 0 : index
    %c0_7 = arith.constant 0 : index
    %8 = vector.load %arg7[%c0_6, %c0_7] : memref<8x128xf32, #tpu.memory_space<vmem>>, vector<8x128xf32>
    tpu.vector_store %arg7[%c0_6, %c0_7], %7 {strides = array<i32>} : memref<8x128xf32, #tpu.memory_space<vmem>>, vector<8x128xf32>,
    %c0_i32_8 = arith.constant 0 : i32
    %9 = arith.cmpi eq, %arg2, %c0_i32_8 : i32
    %10 = arith.extui %9 : i1 to i32
    %c0_i32_9 = arith.constant 0 : i32
    %11 = arith.cmpi ne, %10, %c0_i32_9 : i32
    scf.if %11 {
      %c0_10 = arith.constant 0 : index
      %c0_11 = arith.constant 0 : index
      %12 = vector.load %arg7[%c0_10, %c0_11] : memref<8x128xf32, #tpu.memory_space<vmem>>, vector<8x128xf32>
      %c0_12 = arith.constant 0 : index
      %c0_13 = arith.constant 0 : index
      %13 = vector.load %arg6[%c0_12, %c0_13] : memref<8x128xf32, #tpu.memory_space<vmem>>, vector<8x128xf32>
      tpu.vector_store %arg6[%c0_12, %c0_13], %12 {strides = array<i32>} : memref<8x128xf32, #tpu.memory_space<vmem>>, vector<8x128xf32>,
    } else {
    }
    return
  }
  func.func @transform_0(%arg0: i32, %arg1: i32, %arg2: i32) -> (i32, i32) {
    %c0_i32 = arith.constant 0 : i32
    return %arg0, %arg2 : i32, i32
  }
  func.func @transform_1(%arg0: i32, %arg1: i32, %arg2: i32) -> (i32, i32) {
    %c0_i32 = arith.constant 0 : i32
    return %arg2, %arg1 : i32, i32
  }
  func.func @transform_2(%arg0: i32, %arg1: i32, %arg2: i32) -> (i32, i32) {
    %c0_i32 = arith.constant 0 : i32
    %c0_i32_0 = arith.constant 0 : i32
    return %c0_i32, %arg1 : i32, i32
  }
  func.func @transform_3(%arg0: i32, %arg1: i32, %arg2: i32) -> (i32, i32) {
    %c0_i32 = arith.constant 0 : i32
    return %arg0, %arg1 : i32, i32
  }
}

</mosaic_0001>

<bundles_post_ra>
// kernel: linear_forward.2
= control target key start
LH: loop header
LB: loop body
LE: loop exit
PB: predicated region body
PF: predicated region fallthrough
CT: control target
= control target key end

     0   :  { %s526_s0 = inlined_call_operand.vmem [shape: bf16[32,64], index: 0, kind: input, shape index: {}]   ;;  %s527_s1 = inlined_call_operand.<no memory space> [shape: bf16[], index: 1, kind: input, shape index: {}]   ;;  %s528_s2 = inlined_call_operand.vmem [shape: bf16[8,32], index: 2, kind: input, shape index: {}]   ;;  %s529_s3 = inlined_call_operand.vmem [shape: f32[1,64], index: 3, kind: input, shape index: {}]   ;;  %s530_s4 = inlined_call_operand.<no memory space> [shape: f32[], index: 4, kind: input, shape index: {}]   ;;  %s531_s5 = inlined_call_operand.hbm [shape: f32[8,128], index: 5, kind: output, shape index: {}]  }
   0x1   :  { %v10_v0 = vstv %s527_s1  ;;  %v20_v1 = vstv %s530_s4 }
   0x2   :  { %v11_v2 = vunpack.i.l.bf16 %v10_v0 }
   0x3   :  { %21 = vsyncpa [#allocation19], 0  ;;  %v37_v3 = vld [vmem:[%s528_s2] sm:$0xf]  ;;  %v40_v4 = vlaneseq  ;;  %v364_v10 = vld [vmem:[%s526_s0 + $0x8] sm:$0xff]   ;;  %v467_v18 = vmov 0.0  }
   0x4   :  { %v58_v5 = vld [vmem:[%s526_s0] sm:$0xff]   ;;  %v378_v6 = vpack.c.bf16 %v11_v2, %v11_v2  ;;  %v38_v7 = vunpack.c.l.bf16 %v37_v3  ;;  %v104_v12 = vunpack.c.l.bf16 %v364_v10  ;;  %v127_v13 = vunpack.c.h.bf16 %v364_v10 }
   0x5   :  { %v59_v8 = vunpack.c.l.bf16 %v58_v5  ;;  %v81_v9 = vunpack.c.h.bf16 %v58_v5  ;;  %v41_v11 = vand.u32 127, %v40_v4 }
   0x6   :  { %379 = vst [vmem:[#allocation21 + $0x10] sm:$0xff] %v378_v6   ;;  %384 = vst [vmem:[#allocation21 + $0x18] sm:$0xff] %v378_v6  }
   0x7   :  { %389 = vst [vmem:[#allocation21 + $0x20] sm:$0xff] %v378_v6   ;;  %394 = vst [vmem:[#allocation21 + $0x28] sm:$0xff] %v378_v6   ;;  %vm43_vm0 = vcmp.lt.s32.totalorder %v41_v11, 32  ;;  %vm64_vm1 = vcmp.lt.s32.totalorder %v41_v11, 64 }
   0x8   :  { %399 = vst [vmem:[#allocation21 + $0x30] sm:$0xff] %v378_v6   ;;  %404 = vst [vmem:[#allocation21 + $0x38] sm:$0xff] %v378_v6   ;;  %v44_v14 = vsel %vm43_vm0, %v38_v7, %v11_v2  ;;  %v65_v15 = vsel %vm64_vm1, %v59_v8, %v11_v2  ;;  %v87_v16 = vsel %vm64_vm1, %v81_v9, %v11_v2 }
   0x9   :  { %v110_v17 = vsel %vm64_vm1, %v104_v12, %v11_v2  ;;  %v45_v19 = vpack.c.bf16 %v467_v18, %v44_v14  ;;  %v66_v20 = vpack.c.bf16 %v467_v18, %v65_v15  ;;  %v89_v21 = vpack.c.bf16 %v467_v18, %v87_v16 }
   0xa   :  { %v112_v22 = vpack.c.bf16 %v467_v18, %v110_v17  ;;  %v133_v23 = vsel %vm64_vm1, %v127_v13, %v11_v2 }
   0xb   :  { %48 = vst [vmem:[#allocation20] sm:$0xf] %v45_v19  ;;  %69 = vst [vmem:[#allocation21] sm:$0xf] %v66_v20  ;;  %v135_v24 = vpack.c.bf16 %v467_v18, %v133_v23 }
   0xc   :  { %92 = vst [vmem:[#allocation21 + $0x4] sm:$0xf] %v89_v21  ;;  %115 = vst [vmem:[#allocation21 + $0x8] sm:$0xf] %v112_v22 }
   0xd   :  { %138 = vst [vmem:[#allocation21 + $0xc] sm:$0xf] %v135_v24 }
   0xe   :  { %v353_v25 = vld [vmem:[%s529_s3] sm:$0x1]  ;;  %v355_v26 = vshrl.u32 %v40_v4, 7  ;;  %414 = vmatprep.subr.bf16.mxu0 %v467_v18  ;;  %vm468_vm3 = vmmov 0   ;;  %v439_v32 = vld [vmem:[#allocation21 + $0x28] sm:$0xff]   ;;  %v440_v33 = vld [vmem:[#allocation21 + $0x20] sm:$0xff]  }
   0xf   :  { %v437_v30 = vld [vmem:[#allocation21 + $0x38] sm:$0xff]   ;;  %430 = vmatprep.mubr.msk.bf16.mxu0 %vm468_vm3, %v467_v18  ;;  %v438_v31 = vld [vmem:[#allocation21 + $0x30] sm:$0xff]   ;;  %s469_s3 = smov [#allocation18]  }
  0x10   :  { %vm356_vm2 = vcmp.lt.s32.totalorder %v355_v26, 1  ;;  %415 = vmatpush3.bf16.msra.mxu0 %v437_v30  ;;  %v441_v34 = vld [vmem:[#allocation21 + $0x18] sm:$0xff]   ;;  %v442_v35 = vld [vmem:[#allocation21 + $0x10] sm:$0xff]   ;;  %s345_s4 = sshll.u32 %s469_s3, 4  ;;  %s346_s4 = int_to_ptr.vmem [resolvable:$true] %s345_s4 }
  0x11   :  { %v357_v27 = vsel %vm356_vm2, %v353_v25, %v20_v1  ;;  %416 = vmatprep.subr.bf16.mxu0 %v467_v18  ;;  %s445_s27 = scalar_lea.vmem %s346_s4, 128  ;;  %p450_p1 = scmp.lt.s32.totalorder %s346_s4, %s346_s4 }
  0x12   :  { %v361_v28 = vsel %vm64_vm1, %v357_v27, %v20_v1  ;;  %v227_v38 = vld [vmem:[#allocation20] sm:$0xf]  ;;  %p446_p0 = scmp.ne.s32.totalorder %s346_s4, %s445_s27  ;;  %p451_p2 = scmp.lt.s32.totalorder %s445_s27, %s445_s27 }
  0x13   :  { %362 = vst [vmem:[#allocation23] sm:$0x1] %v361_v28  ;;  %v444_v37 = vld [vmem:[#allocation21] sm:$0xff]  }
  0x14   :  { %417 = vmatpush3.bf16.msra.mxu0 %v438_v31  ;;  %v443_v36 = vld [vmem:[#allocation21 + $0x8] sm:$0xff]   ;;  %p452_p3 = por %p451_p2, %p450_p1 }
  0x15   :  { %418 = vmatprep.subr.bf16.mxu0 %v467_v18 }
  0x16   :  { %p453_p4 = pnand %p452_p3, %p446_p0 }
  0x18   :  { %419 = vmatpush3.bf16.msra.mxu0 %v439_v32 }
  0x19   :  { %420 = vmatprep.subr.bf16.mxu0 %v467_v18 }
  0x1a   :  { %v366_v29 = vld [vmem:[#allocation23] ss:$0 sm:$0xff] }
  0x1c   :  { %421 = vmatpush3.bf16.msra.mxu0 %v440_v33 }
  0x1d   :  { %422 = vmatprep.subr.bf16.mxu0 %v467_v18 }
  0x20   :  { %423 = vmatpush3.bf16.msra.mxu0 %v441_v34 }
  0x21   :  { %424 = vmatprep.subr.bf16.mxu0 %v467_v18 }
  0x24   :  { %425 = vmatpush3.bf16.msra.mxu0 %v442_v35 }
  0x25   :  { %426 = vmatprep.subr.bf16.mxu0 %v467_v18 }
  0x28   :  { %427 = vmatpush3.bf16.msra.mxu0 %v443_v36 }
  0x29   :  { %428 = vmatprep.subr.bf16.mxu0 %v467_v18 }
  0x2c   :  { %429 = vmatpush3.bf16.msra.mxu0 %v444_v37 }
  0x2f   :  { %431 = vmatmul.mubr.bf16.vlgmr.msra.gmra.mxu0 %v227_v38 }
  0xef   :  { %v326_v39 = vpop.f32.mrf.mxu0 }
  0xf0   :  { %v332_v40 = vadd.f32 %v366_v29, %v326_v39 }
  0xf1   :  { %v432_v41 = vpop.f32.mrf.mxu0 }
  0xf2   :  { %338 = vst [vmem:[#allocation18] sm:$0xff] %v332_v40 }
  0xf3   :  { %v329_v42 = vpop.f32.mrf.mxu0 }
  0xf4   :  { %456 = shalt.err (!%p453_p4)
}
  0xf5   :  { %348 = dma.vmem_to_hbm [thread:$0]  %s346_s4, 128, %s531_s5, [#allocation19]   ;;  %v433_v43 = vpop.f32.mrf.mxu0 }
  0xf6   :  { %465 = dma.done.wait [#allocation19], 128  }
  0xf7   :  { %466 = vsyncadd [#allocation19], 4294967168 }
  0xf8   :  { %352 = vsyncpa [#allocation19], 1 }

</bundles_post_ra>
